<compile_context>
chip_gen: v6e
topology: v6e:2x2x1
jax: 0.10.0
libtpu: 0.0.40
codegen_flags: <defaults>
</compile_context>

<pallas_src>
import jax
import jax.numpy as jnp
from jax.experimental import pallas as pl
from jax.experimental.pallas import tpu as pltpu

WORLD_SIZE = 4


def _all_gather_dma_kernel(x0, x1, x2, x3, o_hbm, sems):
    # x0..x3: per-rank [shard_rows, D] raw HBM refs.
    # o_hbm : [world * shard_rows, D] raw HBM ref (gathered output).
    # sems  : DMA semaphores, one per rank copy.
    xs = (x0, x1, x2, x3)
    n = x0.shape[0]

    def copy(r):
        # Static rank index -> static row offset; HBM -> HBM placement copy.
        return pltpu.make_async_copy(
            xs[r],
            o_hbm.at[pl.ds(r * n, n), :],
            sems.at[r],
        )

    # Issue all 4 shard copies first so the DMAs overlap, then wait on all.
    # TODO(synk): if fused next to compute, issue with background DMA priority
    # so these bulk copies don't starve a neighbor kernel's VMEM prefetches.
    for r in range(WORLD_SIZE):
        copy(r).start()
    for r in range(WORLD_SIZE):
        copy(r).wait()


def all_gather_dim0(*x_shards):
    """x_shards: 4 per-rank arrays of shape [shard_rows, D].

    Returns the gathered [4 * shard_rows, D] array (concat along dim 0),
    matching funcol.all_gather_tensor(x, 0, [0, 1, 2, 3]).
    """
    assert len(x_shards) == WORLD_SIZE, len(x_shards)
    n, d = x_shards[0].shape
    dtype = x_shards[0].dtype
    for xr in x_shards:
        assert xr.shape == (n, d) and xr.dtype == dtype

    return pl.pallas_call(
        _all_gather_dma_kernel,
        out_shape=jax.ShapeDtypeStruct((WORLD_SIZE * n, d), dtype),
        # Raw HBM refs on both sides: no auto HBM<->VMEM pipelining, the kernel
        # moves bytes HBM->HBM itself.
        in_specs=[pl.BlockSpec(memory_space=pl.ANY)] * WORLD_SIZE,
        out_specs=pl.BlockSpec(memory_space=pl.ANY),
        scratch_shapes=[pltpu.SemaphoreType.DMA((WORLD_SIZE,))],
    )(*x_shards)


if __name__ == "__main__":
    # Small, (8,128)-aligned per-rank shard with a lane-dense last dim.
    # (For real benchmarking use >= 4 MiB per shard; at this size the run is
    # launch-overhead-bound on every TPU generation.)
    shard_rows, feat = 32, 256
    keys = jax.random.split(jax.random.PRNGKey(0), WORLD_SIZE)
    # Emulated world: 4 separate rank-local tensors (NOT pre-stacked -- the
    # stack would be a hidden full-size copy).
    x_shards = [
        jax.random.normal(keys[r], (shard_rows, feat), dtype=jnp.float32)
        for r in range(WORLD_SIZE)
    ]

    gathered = all_gather_dim0(*x_shards)
    gathered = jax.block_until_ready(gathered)

    # Reference: all_gather along dim 0 == concatenate rank shards along dim 0.
    ref = jnp.concatenate(x_shards, axis=0)

    assert gathered.shape == (WORLD_SIZE * shard_rows, feat), gathered.shape
    assert gathered.dtype == x_shards[0].dtype
    assert bool(jnp.array_equal(gathered, ref))

    print("KERNEL_OK")
</pallas_src>

<mosaic_0001>
module attributes {stable_mosaic.version = 11 : i64} {
  func.func @_all_gather_dma_kernel(%arg0: memref<32x256xf32, #tpu.memory_space<any>>, %arg1: memref<32x256xf32, #tpu.memory_space<any>>, %arg2: memref<32x256xf32, #tpu.memory_space<any>>, %arg3: memref<32x256xf32, #tpu.memory_space<any>>, %arg4: memref<128x256xf32, #tpu.memory_space<any>>, %arg5: memref<4x!tpu.dma_semaphore, #tpu.memory_space<semaphore_mem>>) attributes {dimension_semantics = [], scalar_prefetch = 0 : i64, scratch_operands = 1 : i64, tpu.core_type = #tpu.core_type<tc>} {
    %c0_i32 = arith.constant 0 : i32
    %c0_i32_0 = arith.constant 0 : i32
    %c0_i32_1 = arith.constant 0 : i32
    %0 = tpu.memref_slice %arg4[%c0_i32_0, %c0_i32_1] : memref<128x256xf32, #tpu.memory_space<any>> -> memref<32x256xf32, #tpu.memory_space<any>>
    %1 = tpu.memref_slice %arg5[%c0_i32] : memref<4x!tpu.dma_semaphore, #tpu.memory_space<semaphore_mem>> -> memref<1x!tpu.dma_semaphore, #tpu.memory_space<semaphore_mem>>
    %2 = tpu.memref_squeeze %1 : memref<1x!tpu.dma_semaphore, #tpu.memory_space<semaphore_mem>> -> memref<!tpu.dma_semaphore, #tpu.memory_space<semaphore_mem>>
    tpu.enqueue_dma source(%arg0 : memref<32x256xf32, #tpu.memory_space<any>>) target(%0 : memref<32x256xf32, #tpu.memory_space<any>>) target_semaphore(%2 : memref<!tpu.dma_semaphore, #tpu.memory_space<semaphore_mem>>)
    %c1_i32 = arith.constant 1 : i32
    %c32_i32 = arith.constant 32 : i32
    %c0_i32_2 = arith.constant 0 : i32
    %3 = tpu.memref_slice %arg4[%c32_i32, %c0_i32_2] : memref<128x256xf32, #tpu.memory_space<any>> -> memref<32x256xf32, #tpu.memory_space<any>>
    %4 = tpu.memref_slice %arg5[%c1_i32] : memref<4x!tpu.dma_semaphore, #tpu.memory_space<semaphore_mem>> -> memref<1x!tpu.dma_semaphore, #tpu.memory_space<semaphore_mem>>
    %5 = tpu.memref_squeeze %4 : memref<1x!tpu.dma_semaphore, #tpu.memory_space<semaphore_mem>> -> memref<!tpu.dma_semaphore, #tpu.memory_space<semaphore_mem>>
    tpu.enqueue_dma source(%arg1 : memref<32x256xf32, #tpu.memory_space<any>>) target(%3 : memref<32x256xf32, #tpu.memory_space<any>>) target_semaphore(%5 : memref<!tpu.dma_semaphore, #tpu.memory_space<semaphore_mem>>)
    %c2_i32 = arith.constant 2 : i32
    %c64_i32 = arith.constant 64 : i32
    %c0_i32_3 = arith.constant 0 : i32
    %6 = tpu.memref_slice %arg4[%c64_i32, %c0_i32_3] : memref<128x256xf32, #tpu.memory_space<any>> -> memref<32x256xf32, #tpu.memory_space<any>>
    %7 = tpu.memref_slice %arg5[%c2_i32] : memref<4x!tpu.dma_semaphore, #tpu.memory_space<semaphore_mem>> -> memref<1x!tpu.dma_semaphore, #tpu.memory_space<semaphore_mem>>
    %8 = tpu.memref_squeeze %7 : memref<1x!tpu.dma_semaphore, #tpu.memory_space<semaphore_mem>> -> memref<!tpu.dma_semaphore, #tpu.memory_space<semaphore_mem>>
    tpu.enqueue_dma source(%arg2 : memref<32x256xf32, #tpu.memory_space<any>>) target(%6 : memref<32x256xf32, #tpu.memory_space<any>>) target_semaphore(%8 : memref<!tpu.dma_semaphore, #tpu.memory_space<semaphore_mem>>)
    %c3_i32 = arith.constant 3 : i32
    %c96_i32 = arith.constant 96 : i32
    %c0_i32_4 = arith.constant 0 : i32
    %9 = tpu.memref_slice %arg4[%c96_i32, %c0_i32_4] : memref<128x256xf32, #tpu.memory_space<any>> -> memref<32x256xf32, #tpu.memory_space<any>>
    %10 = tpu.memref_slice %arg5[%c3_i32] : memref<4x!tpu.dma_semaphore, #tpu.memory_space<semaphore_mem>> -> memref<1x!tpu.dma_semaphore, #tpu.memory_space<semaphore_mem>>
    %11 = tpu.memref_squeeze %10 : memref<1x!tpu.dma_semaphore, #tpu.memory_space<semaphore_mem>> -> memref<!tpu.dma_semaphore, #tpu.memory_space<semaphore_mem>>
    tpu.enqueue_dma source(%arg3 : memref<32x256xf32, #tpu.memory_space<any>>) target(%9 : memref<32x256xf32, #tpu.memory_space<any>>) target_semaphore(%11 : memref<!tpu.dma_semaphore, #tpu.memory_space<semaphore_mem>>)
    %c0_i32_5 = arith.constant 0 : i32
    %c0_i32_6 = arith.constant 0 : i32
    %c0_i32_7 = arith.constant 0 : i32
    %12 = tpu.memref_slice %arg4[%c0_i32_6, %c0_i32_7] : memref<128x256xf32, #tpu.memory_space<any>> -> memref<32x256xf32, #tpu.memory_space<any>>
    %13 = tpu.memref_slice %arg5[%c0_i32_5] : memref<4x!tpu.dma_semaphore, #tpu.memory_space<semaphore_mem>> -> memref<1x!tpu.dma_semaphore, #tpu.memory_space<semaphore_mem>>
    %14 = tpu.memref_squeeze %13 : memref<1x!tpu.dma_semaphore, #tpu.memory_space<semaphore_mem>> -> memref<!tpu.dma_semaphore, #tpu.memory_space<semaphore_mem>>
    tpu.wait_dma2 semaphore(%14 : memref<!tpu.dma_semaphore, #tpu.memory_space<semaphore_mem>>) src(%arg0 : memref<32x256xf32, #tpu.memory_space<any>>) dst(%12 : memref<32x256xf32, #tpu.memory_space<any>>)
    %c1_i32_8 = arith.constant 1 : i32
    %c32_i32_9 = arith.constant 32 : i32
    %c0_i32_10 = arith.constant 0 : i32
    %15 = tpu.memref_slice %arg4[%c32_i32_9, %c0_i32_10] : memref<128x256xf32, #tpu.memory_space<any>> -> memref<32x256xf32, #tpu.memory_space<any>>
    %16 = tpu.memref_slice %arg5[%c1_i32_8] : memref<4x!tpu.dma_semaphore, #tpu.memory_space<semaphore_mem>> -> memref<1x!tpu.dma_semaphore, #tpu.memory_space<semaphore_mem>>
    %17 = tpu.memref_squeeze %16 : memref<1x!tpu.dma_semaphore, #tpu.memory_space<semaphore_mem>> -> memref<!tpu.dma_semaphore, #tpu.memory_space<semaphore_mem>>
    tpu.wait_dma2 semaphore(%17 : memref<!tpu.dma_semaphore, #tpu.memory_space<semaphore_mem>>) src(%arg1 : memref<32x256xf32, #tpu.memory_space<any>>) dst(%15 : memref<32x256xf32, #tpu.memory_space<any>>)
    %c2_i32_11 = arith.constant 2 : i32
    %c64_i32_12 = arith.constant 64 : i32
    %c0_i32_13 = arith.constant 0 : i32
    %18 = tpu.memref_slice %arg4[%c64_i32_12, %c0_i32_13] : memref<128x256xf32, #tpu.memory_space<any>> -> memref<32x256xf32, #tpu.memory_space<any>>
    %19 = tpu.memref_slice %arg5[%c2_i32_11] : memref<4x!tpu.dma_semaphore, #tpu.memory_space<semaphore_mem>> -> memref<1x!tpu.dma_semaphore, #tpu.memory_space<semaphore_mem>>
    %20 = tpu.memref_squeeze %19 : memref<1x!tpu.dma_semaphore, #tpu.memory_space<semaphore_mem>> -> memref<!tpu.dma_semaphore, #tpu.memory_space<semaphore_mem>>
    tpu.wait_dma2 semaphore(%20 : memref<!tpu.dma_semaphore, #tpu.memory_space<semaphore_mem>>) src(%arg2 : memref<32x256xf32, #tpu.memory_space<any>>) dst(%18 : memref<32x256xf32, #tpu.memory_space<any>>)
    %c3_i32_14 = arith.constant 3 : i32
    %c96_i32_15 = arith.constant 96 : i32
    %c0_i32_16 = arith.constant 0 : i32
    %21 = tpu.memref_slice %arg4[%c96_i32_15, %c0_i32_16] : memref<128x256xf32, #tpu.memory_space<any>> -> memref<32x256xf32, #tpu.memory_space<any>>
    %22 = tpu.memref_slice %arg5[%c3_i32_14] : memref<4x!tpu.dma_semaphore, #tpu.memory_space<semaphore_mem>> -> memref<1x!tpu.dma_semaphore, #tpu.memory_space<semaphore_mem>>
    %23 = tpu.memref_squeeze %22 : memref<1x!tpu.dma_semaphore, #tpu.memory_space<semaphore_mem>> -> memref<!tpu.dma_semaphore, #tpu.memory_space<semaphore_mem>>
    tpu.wait_dma2 semaphore(%23 : memref<!tpu.dma_semaphore, #tpu.memory_space<semaphore_mem>>) src(%arg3 : memref<32x256xf32, #tpu.memory_space<any>>) dst(%21 : memref<32x256xf32, #tpu.memory_space<any>>)
    return
  }
}

</mosaic_0001>

<bundles_post_ra>
// kernel: tpu_custom_call.1
= control target key start
LH: loop header
LB: loop body
LE: loop exit
PB: predicated region body
PF: predicated region fallthrough
CT: control target
= control target key end

     0   :  { %s98_s18 = smov [#allocation2]   ;;  %s99_s19 = smov 131072   ;;  %s153_s0 = inlined_call_operand.hbm [shape: f32[32,256], index: 0, kind: input, shape index: {}]   ;;  %s154_s4 = inlined_call_operand.hbm [shape: f32[128,256], index: 4, kind: output, shape index: {}]   ;;  %s155_s1 = inlined_call_operand.hbm [shape: f32[32,256], index: 1, kind: input, shape index: {}]   ;;  %s156_s2 = inlined_call_operand.hbm [shape: f32[32,256], index: 2, kind: input, shape index: {}]   ;;  %s157_s3 = inlined_call_operand.hbm [shape: f32[32,256], index: 3, kind: input, shape index: {}]  }
   0x1   :  { %s16_s17 = scalar_lea.hbm %s154_s4, 1024  ;;  %s100_s20 = smov 0  }
   0x2   :  { %15 = dma.general %s153_s0, 1024, %s154_s4, %s98_s18, %s99_s19, [#allocation4], %s100_s20, 0  }
   0x3   :  { %s25_s27 = scalar_lea.hbm %s154_s4, 2048  ;;  %s101_s28 = smov [#allocation2 + $0x1]  }
   0x4   :  { %24 = dma.general %s155_s1, 1024, %s16_s17, %s101_s28, %s99_s19, [#allocation6], %s100_s20, 0  }
   0x5   :  { %s34_s7 = scalar_lea.hbm %s154_s4, 3072  ;;  %s102_s8 = smov [#allocation2 + $0x2]  }
   0x6   :  { %33 = dma.general %s156_s2, 1024, %s25_s27, %s102_s8, %s99_s19, [#allocation8], %s100_s20, 0  }
   0x7   :  { %s103_s11 = smov [#allocation2 + $0x3]  }
   0x8   :  { %42 = dma.general %s157_s3, 1024, %s34_s7, %s103_s11, %s99_s19, [#allocation10], %s100_s20, 0  }
   0x9   :  { %90 = dma.done.wait [#allocation2], 1024 }
   0xa   :  { %91 = vsyncadd [#allocation2], 4294966272 }
   0xb   :  { %92 = dma.done.wait [#allocation2 + $0x1], 1024 }
   0xc   :  { %93 = vsyncadd [#allocation2 + $0x1], 4294966272 }
   0xd   :  { %94 = dma.done.wait [#allocation2 + $0x2], 1024 }
   0xe   :  { %95 = vsyncadd [#allocation2 + $0x2], 4294966272 }
   0xf   :  { %96 = dma.done.wait [#allocation2 + $0x3], 1024 }
  0x10   :  { %97 = vsyncadd [#allocation2 + $0x3], 4294966272 }
  0x11   :  { %53 = vsyncmov [#allocation2] }
  0x14   :  { %s54_s1 = vpop.sfrf %53 }
  0x15   :  { %p80_p0 = scmp.ne.s32.totalorder %s54_s1, 0 }
  0x17   :  { %58 = shalt.err (%p80_p0)  }
  0x18   :  { %60 = vsyncmov [#allocation2 + $0x1] }
  0x1b   :  { %s61_s4 = vpop.sfrf %60 }
  0x1c   :  { %p81_p1 = scmp.ne.s32.totalorder %s61_s4, 0 }
  0x1e   :  { %65 = shalt.err (%p81_p1)  }
  0x1f   :  { %67 = vsyncmov [#allocation2 + $0x2] }
  0x22   :  { %s68_s2 = vpop.sfrf %67 }
  0x23   :  { %p82_p2 = scmp.ne.s32.totalorder %s68_s2, 0 }
  0x25   :  { %72 = shalt.err (%p82_p2)  }
  0x26   :  { %74 = vsyncmov [#allocation2 + $0x3] }
  0x29   :  { %s75_s3 = vpop.sfrf %74 }
  0x2a   :  { %p83_p3 = scmp.ne.s32.totalorder %s75_s3, 0 }
  0x2c   :  { %79 = shalt.err (%p83_p3)  }

</bundles_post_ra>
